<compile_context>
chip_gen: v6e
topology: v6e:2x2x1
jax: 0.10.0
libtpu: 0.0.40
codegen_flags: <defaults>
</compile_context>

<pallas_src>
import numpy as np
import jax
import jax.numpy as jnp
from jax.experimental import pallas as pl
from jax.experimental.pallas import tpu as pltpu


_UNROLL_REDUCE_D = 16   # unroll sublane reductions fully when d is this small


def _row_sum(a, unroll):
    """Sum a (D, R) array over its sublane (D) axis -> (1, R)."""
    if unroll:
        acc = a[0:1, :]
        for j in range(1, a.shape[0]):
            acc = acc + a[j:j + 1, :]
        return acc
    return jnp.sum(a, axis=0, keepdims=True)


def _row_max(a, unroll):
    """Max of a (D, R) array over its sublane (D) axis -> (1, R)."""
    if unroll:
        acc = a[0:1, :]
        for j in range(1, a.shape[0]):
            acc = jnp.maximum(acc, a[j:j + 1, :])
        return acc
    return jnp.max(a, axis=0, keepdims=True)


def _log_tsallis15_kernel(x_ref, o_ref):
    x = x_ref[...].astype(jnp.float32)        # (D, R): entmax axis on sublanes, rows on lanes
    d = x.shape[0]
    unroll = d <= _UNROLL_REDUCE_D

    # z = (X - max) / 2, as in the torch forward.
    z = (x - _row_max(x, unroll)) * 0.5       # (D, R)

    # Prefix statistics at each element's own rank (sort-free pairwise form).
    # One unrolled pass over the d candidates: candidate i is compared against
    # every j at once on the VPU; no (D, D, R) pairwise tensor is materialized.
    # TODO(synk): for very large d (codebook-sized), chunk this loop / use an MXU
    # contraction instead of a d-long unrolled Python loop.
    cnt = jnp.zeros_like(z)                   # r_j
    s1 = jnp.zeros_like(z)                    # sum of z_i with z_i >= z_j
    s2 = jnp.zeros_like(z)                    # sum of z_i^2 with z_i >= z_j
    for i in range(d):
        zi = z[i:i + 1, :]                    # (1, R)
        ge = zi >= z                          # (D, R): z_i >= z_j for every j
        cnt = cnt + ge.astype(jnp.float32)
        s1 = s1 + jnp.where(ge, zi, 0.0)      # where-guard: no 0 * (-inf) = NaN
        s2 = s2 + jnp.where(ge, zi * zi, 0.0)

    inv_r = 1.0 / cnt                         # cnt >= 1 always (z_j >= z_j)
    mean = s1 * inv_r
    mean_sq = s2 * inv_r
    ss = cnt * (mean_sq - mean * mean)
    delta = (1.0 - ss) * inv_r
    tau = mean - jnp.sqrt(jnp.maximum(delta, 0.0))   # (D, R): tau of the r_j-prefix

    # support_size = #{j : tau_j <= z_j}  (== torch's (tau <= Xsrt).sum(dim))
    in_supp = (tau <= z).astype(jnp.float32)
    supp_size = _row_sum(in_supp, unroll)            # (1, R)

    # tau* = tau of the element whose rank equals support_size (exactly one for
    # distinct values; rank-ties share an identical tau, so averaging is safe).
    hit = cnt == supp_size
    n_hit = _row_sum(hit.astype(jnp.float32), unroll)
    t_sum = _row_sum(jnp.where(hit, tau, 0.0), unroll)
    tau_star = t_sum / n_hit                         # (1, R)

    p = jnp.maximum(z - tau_star, 0.0)
    o_ref[...] = jnp.log(p * p).astype(o_ref.dtype)  # log(0) -> -inf, as torch


def _choose_lane_block(rows, d, dtype_bytes):
    """Pick a lane-axis (rows) block: multiple of 128 that divides rows, as large
    as a conservative VMEM budget allows, keeping >= 2 grid steps when possible
    so v7x's two TensorCores both get work."""
    if rows % 128 != 0:
        return rows, 1                        # full-extent block is always legal
    budget = 20 * 1024 * 1024                 # stay well inside default scoped VMEM
    per_lane = d * (10 * 4 + 4 * dtype_bytes)  # ~10 live f32 temps + 2x-buffered I/O
    max_block = max(128, (budget // per_lane) // 128 * 128)
    divisors = [b for b in range(128, min(rows, max_block) + 1, 128) if rows % b == 0]
    if not divisors:
        return rows, 1
    multi = [b for b in divisors if rows // b >= 2]
    br = max(multi) if multi else max(divisors)
    return br, rows // br


def log_tsallis15(x, dim=0):
    """Pallas TPU implementation of LogTsallis15(dim).forward(x) = log(entmax_1.5(x, dim))."""
    orig_dtype = x.dtype
    # Layout plumbing: entmax axis -> sublanes (leading), everything else flattened
    # onto the lane axis so in-kernel loads/stores are lane-dense and unmasked.
    xm = jnp.moveaxis(x, dim, 0)
    d = xm.shape[0]
    lead_shape = xm.shape[1:]
    rows = int(np.prod(lead_shape)) if lead_shape else 1
    x2 = xm.reshape(d, rows)                  # keep the caller's dtype for the DMA

    br, nblk = _choose_lane_block(rows, d, jnp.dtype(orig_dtype).itemsize)

    out = pl.pallas_call(
        _log_tsallis15_kernel,
        out_shape=jax.ShapeDtypeStruct((d, rows), orig_dtype),
        grid_spec=pltpu.PrefetchScalarGridSpec(
            num_scalar_prefetch=0,
            grid=(nblk,),
            in_specs=[pl.BlockSpec((d, br), lambda i: (0, i))],
            out_specs=pl.BlockSpec((d, br), lambda i: (0, i)),
        ),
        compiler_params=pltpu.CompilerParams(
            dimension_semantics=("parallel",)),
    )(x2)

    out = out.reshape((d,) + lead_shape)
    return jnp.moveaxis(out, 0, dim)


def _ref_log_tsallis15(x, dim):
    """Pure-JAX mirror of the PyTorch forward (sort + cumsum form)."""
    x = x.astype(jnp.float32)
    z = (x - jnp.max(x, axis=dim, keepdims=True)) / 2.0
    zsrt = -jnp.sort(-z, axis=dim)                       # descending sort
    d = x.shape[dim]
    view = [1] * x.ndim
    view[dim] = d
    rho = jnp.arange(1, d + 1, dtype=jnp.float32).reshape(view)
    mean = jnp.cumsum(zsrt, axis=dim) / rho
    mean_sq = jnp.cumsum(zsrt * zsrt, axis=dim) / rho
    ss = rho * (mean_sq - mean * mean)
    delta_nz = jnp.clip((1.0 - ss) / rho, 0.0, None)
    tau = mean - jnp.sqrt(delta_nz)
    supp_size = jnp.sum(tau <= zsrt, axis=dim, keepdims=True)
    tau_star = jnp.take_along_axis(tau, supp_size - 1, axis=dim)
    y = jnp.clip(z - tau_star, 0.0, None) ** 2
    return jnp.log(y)


if __name__ == "__main__":
    # LogTsallis15(dim=1) applied channel-wise to an NCHW activation (B=2, C=4, H=W=16).
    # The module has no learnable parameters.
    key = jax.random.PRNGKey(0)
    x = jax.random.normal(key, (2, 4, 16, 16), dtype=jnp.float32)

    out = log_tsallis15(x, dim=1)
    out = jax.block_until_ready(out)

    ref = _ref_log_tsallis15(x, dim=1)
    out_np = np.asarray(out, dtype=np.float32)
    ref_np = np.asarray(ref, dtype=np.float32)

    # (1) entmax probabilities (exp of the log output) must match tightly everywhere
    #     (also covers the -inf / zero-probability pattern).
    np.testing.assert_allclose(np.exp(out_np), np.exp(ref_np), rtol=1e-5, atol=1e-6)
    # (2) log values where well-conditioned: log() amplifies f32 rounding of the
    #     threshold for entries vanishingly close to the support boundary, so
    #     compare the finite, non-degenerate entries with a sane tolerance.
    mask = ref_np > -12.0
    np.testing.assert_allclose(out_np[mask], ref_np[mask], rtol=1e-4, atol=1e-4)

    print("KERNEL_OK")
</pallas_src>

<mosaic_0001>
module attributes {stable_mosaic.version = 11 : i64} {
  func.func @_log_tsallis15_kernel(%arg0: i32, %arg1: memref<4x256xf32, #tpu.memory_space<vmem>>, %arg2: memref<4x256xf32, #tpu.memory_space<vmem>>) attributes {dimension_semantics = [#tpu.dimension_semantics<parallel>], iteration_bounds = array<i64: 2>, scalar_prefetch = 0 : i64, scratch_operands = 0 : i64, tpu.core_type = #tpu.core_type<tc>, window_params = [{transform_indices = @transform_0, window_bounds = array<i64: 4, 256>}, {transform_indices = @transform_1, window_bounds = array<i64: 4, 256>}]} {
    %c0 = arith.constant 0 : index
    %c0_0 = arith.constant 0 : index
    %0 = vector.load %arg1[%c0, %c0_0] : memref<4x256xf32, #tpu.memory_space<vmem>>, vector<4x256xf32>
    %1 = vector.extract_strided_slice %0 {offsets = [0, 0], sizes = [1, 256], strides = [1, 1]} : vector<4x256xf32> to vector<1x256xf32>
    %2 = vector.extract_strided_slice %0 {offsets = [1, 0], sizes = [1, 256], strides = [1, 1]} : vector<4x256xf32> to vector<1x256xf32>
    %3 = arith.maximumf %1, %2 : vector<1x256xf32>
    %4 = vector.extract_strided_slice %0 {offsets = [2, 0], sizes = [1, 256], strides = [1, 1]} : vector<4x256xf32> to vector<1x256xf32>
    %5 = arith.maximumf %3, %4 : vector<1x256xf32>
    %6 = vector.extract_strided_slice %0 {offsets = [3, 0], sizes = [1, 256], strides = [1, 1]} : vector<4x256xf32> to vector<1x256xf32>
    %7 = arith.maximumf %5, %6 : vector<1x256xf32>
    %8 = vector.broadcast %7 : vector<1x256xf32> to vector<4x256xf32>
    %9 = arith.subf %0, %8 : vector<4x256xf32>
    %cst = arith.constant 5.000000e-01 : f32
    %10 = vector.broadcast %cst : f32 to vector<4x256xf32>
    %11 = arith.mulf %9, %10 : vector<4x256xf32>
    %cst_1 = arith.constant 0.000000e+00 : f32
    %12 = vector.broadcast %cst_1 : f32 to vector<4x256xf32>
    %cst_2 = arith.constant 0.000000e+00 : f32
    %13 = vector.broadcast %cst_2 : f32 to vector<4x256xf32>
    %cst_3 = arith.constant 0.000000e+00 : f32
    %14 = vector.broadcast %cst_3 : f32 to vector<4x256xf32>
    %15 = vector.extract_strided_slice %11 {offsets = [0, 0], sizes = [1, 256], strides = [1, 1]} : vector<4x256xf32> to vector<1x256xf32>
    %16 = vector.broadcast %15 : vector<1x256xf32> to vector<4x256xf32>
    %17 = arith.cmpf oge, %16, %11 : vector<4x256xf32>
    %18 = arith.extui %17 : vector<4x256xi1> to vector<4x256xi32>
    %19 = arith.sitofp %18 : vector<4x256xi32> to vector<4x256xf32>
    %20 = arith.addf %12, %19 : vector<4x256xf32>
    %cst_4 = arith.constant 0.000000e+00 : f32
    %21 = vector.shape_cast %15 : vector<1x256xf32> to vector<1x256xf32>
    %22 = vector.broadcast %21 : vector<1x256xf32> to vector<4x256xf32>
    %23 = vector.broadcast %cst_4 : f32 to vector<4x256xf32>
    %24 = arith.select %17, %22, %23 : vector<4x256xi1>, vector<4x256xf32>
    %25 = arith.addf %13, %24 : vector<4x256xf32>
    %26 = arith.mulf %15, %15 : vector<1x256xf32>
    %cst_5 = arith.constant 0.000000e+00 : f32
    %27 = vector.shape_cast %26 : vector<1x256xf32> to vector<1x256xf32>
    %28 = vector.broadcast %27 : vector<1x256xf32> to vector<4x256xf32>
    %29 = vector.broadcast %cst_5 : f32 to vector<4x256xf32>
    %30 = arith.select %17, %28, %29 : vector<4x256xi1>, vector<4x256xf32>
    %31 = arith.addf %14, %30 : vector<4x256xf32>
    %32 = vector.extract_strided_slice %11 {offsets = [1, 0], sizes = [1, 256], strides = [1, 1]} : vector<4x256xf32> to vector<1x256xf32>
    %33 = vector.broadcast %32 : vector<1x256xf32> to vector<4x256xf32>
    %34 = arith.cmpf oge, %33, %11 : vector<4x256xf32>
    %35 = arith.extui %34 : vector<4x256xi1> to vector<4x256xi32>
    %36 = arith.sitofp %35 : vector<4x256xi32> to vector<4x256xf32>
    %37 = arith.addf %20, %36 : vector<4x256xf32>
    %cst_6 = arith.constant 0.000000e+00 : f32
    %38 = vector.shape_cast %32 : vector<1x256xf32> to vector<1x256xf32>
    %39 = vector.broadcast %38 : vector<1x256xf32> to vector<4x256xf32>
    %40 = vector.broadcast %cst_6 : f32 to vector<4x256xf32>
    %41 = arith.select %34, %39, %40 : vector<4x256xi1>, vector<4x256xf32>
    %42 = arith.addf %25, %41 : vector<4x256xf32>
    %43 = arith.mulf %32, %32 : vector<1x256xf32>
    %cst_7 = arith.constant 0.000000e+00 : f32
    %44 = vector.shape_cast %43 : vector<1x256xf32> to vector<1x256xf32>
    %45 = vector.broadcast %44 : vector<1x256xf32> to vector<4x256xf32>
    %46 = vector.broadcast %cst_7 : f32 to vector<4x256xf32>
    %47 = arith.select %34, %45, %46 : vector<4x256xi1>, vector<4x256xf32>
    %48 = arith.addf %31, %47 : vector<4x256xf32>
    %49 = vector.extract_strided_slice %11 {offsets = [2, 0], sizes = [1, 256], strides = [1, 1]} : vector<4x256xf32> to vector<1x256xf32>
    %50 = vector.broadcast %49 : vector<1x256xf32> to vector<4x256xf32>
    %51 = arith.cmpf oge, %50, %11 : vector<4x256xf32>
    %52 = arith.extui %51 : vector<4x256xi1> to vector<4x256xi32>
    %53 = arith.sitofp %52 : vector<4x256xi32> to vector<4x256xf32>
    %54 = arith.addf %37, %53 : vector<4x256xf32>
    %cst_8 = arith.constant 0.000000e+00 : f32
    %55 = vector.shape_cast %49 : vector<1x256xf32> to vector<1x256xf32>
    %56 = vector.broadcast %55 : vector<1x256xf32> to vector<4x256xf32>
    %57 = vector.broadcast %cst_8 : f32 to vector<4x256xf32>
    %58 = arith.select %51, %56, %57 : vector<4x256xi1>, vector<4x256xf32>
    %59 = arith.addf %42, %58 : vector<4x256xf32>
    %60 = arith.mulf %49, %49 : vector<1x256xf32>
    %cst_9 = arith.constant 0.000000e+00 : f32
    %61 = vector.shape_cast %60 : vector<1x256xf32> to vector<1x256xf32>
    %62 = vector.broadcast %61 : vector<1x256xf32> to vector<4x256xf32>
    %63 = vector.broadcast %cst_9 : f32 to vector<4x256xf32>
    %64 = arith.select %51, %62, %63 : vector<4x256xi1>, vector<4x256xf32>
    %65 = arith.addf %48, %64 : vector<4x256xf32>
    %66 = vector.extract_strided_slice %11 {offsets = [3, 0], sizes = [1, 256], strides = [1, 1]} : vector<4x256xf32> to vector<1x256xf32>
    %67 = vector.broadcast %66 : vector<1x256xf32> to vector<4x256xf32>
    %68 = arith.cmpf oge, %67, %11 : vector<4x256xf32>
    %69 = arith.extui %68 : vector<4x256xi1> to vector<4x256xi32>
    %70 = arith.sitofp %69 : vector<4x256xi32> to vector<4x256xf32>
    %71 = arith.addf %54, %70 : vector<4x256xf32>
    %cst_10 = arith.constant 0.000000e+00 : f32
    %72 = vector.shape_cast %66 : vector<1x256xf32> to vector<1x256xf32>
    %73 = vector.broadcast %72 : vector<1x256xf32> to vector<4x256xf32>
    %74 = vector.broadcast %cst_10 : f32 to vector<4x256xf32>
    %75 = arith.select %68, %73, %74 : vector<4x256xi1>, vector<4x256xf32>
    %76 = arith.addf %59, %75 : vector<4x256xf32>
    %77 = arith.mulf %66, %66 : vector<1x256xf32>
    %cst_11 = arith.constant 0.000000e+00 : f32
    %78 = vector.shape_cast %77 : vector<1x256xf32> to vector<1x256xf32>
    %79 = vector.broadcast %78 : vector<1x256xf32> to vector<4x256xf32>
    %80 = vector.broadcast %cst_11 : f32 to vector<4x256xf32>
    %81 = arith.select %68, %79, %80 : vector<4x256xi1>, vector<4x256xf32>
    %82 = arith.addf %65, %81 : vector<4x256xf32>
    %cst_12 = arith.constant 1.000000e+00 : f32
    %83 = vector.broadcast %cst_12 : f32 to vector<4x256xf32>
    %84 = arith.divf %83, %71 : vector<4x256xf32>
    %85 = arith.mulf %76, %84 : vector<4x256xf32>
    %86 = arith.mulf %82, %84 : vector<4x256xf32>
    %87 = arith.mulf %85, %85 : vector<4x256xf32>
    %88 = arith.subf %86, %87 : vector<4x256xf32>
    %89 = arith.mulf %71, %88 : vector<4x256xf32>
    %cst_13 = arith.constant 1.000000e+00 : f32
    %90 = vector.broadcast %cst_13 : f32 to vector<4x256xf32>
    %91 = arith.subf %90, %89 : vector<4x256xf32>
    %92 = arith.mulf %91, %84 : vector<4x256xf32>
    %cst_14 = arith.constant 0.000000e+00 : f32
    %93 = vector.broadcast %cst_14 : f32 to vector<4x256xf32>
    %94 = arith.maximumf %92, %93 : vector<4x256xf32>
    %95 = math.sqrt %94 : vector<4x256xf32>
    %96 = arith.subf %85, %95 : vector<4x256xf32>
    %97 = arith.cmpf ole, %96, %11 : vector<4x256xf32>
    %98 = arith.extui %97 : vector<4x256xi1> to vector<4x256xi32>
    %99 = arith.sitofp %98 : vector<4x256xi32> to vector<4x256xf32>
    %100 = vector.extract_strided_slice %99 {offsets = [0, 0], sizes = [1, 256], strides = [1, 1]} : vector<4x256xf32> to vector<1x256xf32>
    %101 = vector.extract_strided_slice %99 {offsets = [1, 0], sizes = [1, 256], strides = [1, 1]} : vector<4x256xf32> to vector<1x256xf32>
    %102 = arith.addf %100, %101 : vector<1x256xf32>
    %103 = vector.extract_strided_slice %99 {offsets = [2, 0], sizes = [1, 256], strides = [1, 1]} : vector<4x256xf32> to vector<1x256xf32>
    %104 = arith.addf %102, %103 : vector<1x256xf32>
    %105 = vector.extract_strided_slice %99 {offsets = [3, 0], sizes = [1, 256], strides = [1, 1]} : vector<4x256xf32> to vector<1x256xf32>
    %106 = arith.addf %104, %105 : vector<1x256xf32>
    %107 = vector.broadcast %106 : vector<1x256xf32> to vector<4x256xf32>
    %108 = arith.cmpf oeq, %71, %107 : vector<4x256xf32>
    %109 = arith.extui %108 : vector<4x256xi1> to vector<4x256xi32>
    %110 = arith.sitofp %109 : vector<4x256xi32> to vector<4x256xf32>
    %111 = vector.extract_strided_slice %110 {offsets = [0, 0], sizes = [1, 256], strides = [1, 1]} : vector<4x256xf32> to vector<1x256xf32>
    %112 = vector.extract_strided_slice %110 {offsets = [1, 0], sizes = [1, 256], strides = [1, 1]} : vector<4x256xf32> to vector<1x256xf32>
    %113 = arith.addf %111, %112 : vector<1x256xf32>
    %114 = vector.extract_strided_slice %110 {offsets = [2, 0], sizes = [1, 256], strides = [1, 1]} : vector<4x256xf32> to vector<1x256xf32>
    %115 = arith.addf %113, %114 : vector<1x256xf32>
    %116 = vector.extract_strided_slice %110 {offsets = [3, 0], sizes = [1, 256], strides = [1, 1]} : vector<4x256xf32> to vector<1x256xf32>
    %117 = arith.addf %115, %116 : vector<1x256xf32>
    %cst_15 = arith.constant 0.000000e+00 : f32
    %118 = vector.broadcast %cst_15 : f32 to vector<4x256xf32>
    %119 = arith.select %108, %96, %118 : vector<4x256xi1>, vector<4x256xf32>
    %120 = vector.extract_strided_slice %119 {offsets = [0, 0], sizes = [1, 256], strides = [1, 1]} : vector<4x256xf32> to vector<1x256xf32>
    %121 = vector.extract_strided_slice %119 {offsets = [1, 0], sizes = [1, 256], strides = [1, 1]} : vector<4x256xf32> to vector<1x256xf32>
    %122 = arith.addf %120, %121 : vector<1x256xf32>
    %123 = vector.extract_strided_slice %119 {offsets = [2, 0], sizes = [1, 256], strides = [1, 1]} : vector<4x256xf32> to vector<1x256xf32>
    %124 = arith.addf %122, %123 : vector<1x256xf32>
    %125 = vector.extract_strided_slice %119 {offsets = [3, 0], sizes = [1, 256], strides = [1, 1]} : vector<4x256xf32> to vector<1x256xf32>
    %126 = arith.addf %124, %125 : vector<1x256xf32>
    %127 = arith.divf %126, %117 : vector<1x256xf32>
    %128 = vector.broadcast %127 : vector<1x256xf32> to vector<4x256xf32>
    %129 = arith.subf %11, %128 : vector<4x256xf32>
    %cst_16 = arith.constant 0.000000e+00 : f32
    %130 = vector.broadcast %cst_16 : f32 to vector<4x256xf32>
    %131 = arith.maximumf %129, %130 : vector<4x256xf32>
    %132 = arith.mulf %131, %131 : vector<4x256xf32>
    %133 = math.log %132 : vector<4x256xf32>
    %c0_17 = arith.constant 0 : index
    %c0_18 = arith.constant 0 : index
    %134 = vector.load %arg2[%c0_17, %c0_18] : memref<4x256xf32, #tpu.memory_space<vmem>>, vector<4x256xf32>
    tpu.vector_store %arg2[%c0_17, %c0_18], %133 {strides = array<i32>} : memref<4x256xf32, #tpu.memory_space<vmem>>, vector<4x256xf32>,
    return
  }
  func.func @transform_0(%arg0: i32) -> (i32, i32) {
    %c0_i32 = arith.constant 0 : i32
    %c0_i32_0 = arith.constant 0 : i32
    return %c0_i32, %arg0 : i32, i32
  }
  func.func @transform_1(%arg0: i32) -> (i32, i32) {
    %c0_i32 = arith.constant 0 : i32
    %c0_i32_0 = arith.constant 0 : i32
    return %c0_i32, %arg0 : i32, i32
  }
}

</mosaic_0001>

<bundles_post_ra>
// kernel: tpu_custom_call.1
= control target key start
LH: loop header
LB: loop body
LE: loop exit
PB: predicated region body
PF: predicated region fallthrough
CT: control target
= control target key end

     0   :  { %6 = vsyncpa [#allocation3], 0  ;;  %s1102_s0 = inlined_call_operand.hbm [shape: f32[4,512], index: 0, kind: input, shape index: {}]   ;;  %s1103_s1 = inlined_call_operand.hbm [shape: f32[4,512], index: 1, kind: output, shape index: {}]  }
   0x1   :  { %8 = vsyncpa [#allocation3 + $0x1], 0 }
   0x2   :  { %9 = vsyncpa [#allocation4], 0 }
   0x3   :  { %11 = vsyncpa [#allocation4 + $0x1], 0  ;;  %s811_s6 = smov 0   ;;  %s813_s7 = smov 0  }
   0x4   :  { %s815_s8 = smov 0   ;;  %s817_s9 = smov 0  }
   0x5 LB: > { %s832_s10 = sadd.s32 4294967295, %s796_s9   ;;  %s612_s11 = sadd.s32 4294967294, %s796_s9   ;;  %s796_s9 = sphi %s817_s9, %s1120_s9   ;;  %s792_s8 = sphi %s815_s8, %s1119_s8   ;;  %s788_s7 = sphi %s813_s7, %s1118_s7   ;;  %s784_s6 = sphi %s811_s6, %s1117_s6  }
   0x6   : > { %s836_s12 = sadd.s32 1, %s796_s9   ;;  %s24_s13 = sadd.s32 1, %s792_s8 }
   0x7   : > { %s21_s14 = ssub.s32 %s796_s9, %s836_s12  ;;  %p31_p0 = scmp.ne.s32.totalorder %s792_s8, %s788_s7 }
   0x8   : > { %p22_p1 = scmp.eq.s32.totalorder %s21_s14, 0  ;;  %p32_p2 = scmp.eq.s32.totalorder %s796_s9, 0 }
   0x9   : > { %p37_p3 = scmp.ne.s32.totalorder %s788_s7, %s784_s6  ;;  %p38_p4 = scmp.eq.s32.totalorder %s832_s10, 0 }
   0xa   : > { %s848_s15 = scalar_select %p22_p1, %s792_s8, %s24_s13  }
   0xb   : > { %p850_p5 = por %p32_p2, %p31_p0  ;;  %p854_p6 = por %p38_p4, %p37_p3 }
   0xc   : > { %p61_p7 = scmp.eq.s32.totalorder %s832_s10, 1  ;;  %p67_p8 = scmp.eq.s32.totalorder %s612_s11, 1 }
   0xd   : > { %s1107_s17 = scalar_select %p854_p6, 1, 0 }
   0xe   : > { %p655_p10 = scmp.lt.s32.totalorder %s796_s9, 2  ;;  %p861_p11 = por %p61_p7, %p31_p0 }
   0xf   : > { %p865_p12 = por %p67_p8, %p37_p3  ;;  %s87_s20 = sand.u32 1, %s792_s8  }
  0x10   : > { %s1108_s18 = scalar_select %p861_p11, 1, 0 }
  0x11   : > { %s1109_s19 = scalar_select %p865_p12, 1, 0 }
  0x12   : > { %s641_s21 = sshll.u32 %s796_s9, 7  ;;  %s615_s22 = sshll.u32 %s87_s20, 3 }
  0x13   : > { %s874_s25 = scalar_lea.hbm %s1102_s0, %s641_s21  ;;  %s91_s26 = scalar_lea.vmem [#allocation2], %s615_s22 }
  0x14   : > { %s99_s27 = sshll.u32 %s91_s26, 4  ;;  %p878_p13 = pnand %p655_p10, %p850_p5  ;;  %s882_s27 = int_to_ptr.vmem [resolvable:$true] %s99_s27 }
  0x15   : > { %s88_s29 = scalar_lea.sflag [#allocation3], %s87_s20  ;;  %s704_s30 = scalar_lea.hbm %s874_s25, 128 }
  0x16   : > { %p705_p2 = scmp.ne.s32.totalorder %s874_s25, %s704_s30  ;;  %p706_p3 = pneg %p878_p13 }
  0x17   : > { %s709_s4 = scalar_lea.hbm %s1102_s0, 256  ;;  %p710_p5 = scmp.lt.s32.totalorder %s874_s25, %s1102_s0 }
  0x18   : > { %p707_p4 = pnand %p706_p3, %p705_p2  ;;  %p711_p8 = scmp.lt.s32.totalorder %s709_s4, %s704_s30 }
  0x1a   : > { %p708_p7 = pneg %p707_p4  ;;  %p712_p10 = por %p711_p8, %p710_p5 }
  0x1c   : > { %p713_p9 = pnand %p712_p10, %p708_p7 }
  0x1e   : > { %716 = shalt.err (!%p713_p9)
}
  0x1f   : > { %s717_s13 = scalar_lea.vmem %s882_s27, 128  ;;  %s798_s14 = smov [#allocation2]  }
  0x20   : > { %p718_p0 = scmp.ne.s32.totalorder %s882_s27, %s717_s13  ;;  %s722_s16 = sshll.u32 %s798_s14, 4  ;;  %s723_s16 = int_to_ptr.vmem [resolvable:$false] %s722_s16 }
  0x21   : > { %s724_s20 = scalar_lea.vmem %s723_s16, 256  ;;  %p725_p4 = scmp.lt.s32.totalorder %s882_s27, %s723_s16 }
  0x22   : > { %p720_p1 = pnand %p718_p0, %p706_p3  ;;  %p726_p12 = scmp.lt.s32.totalorder %s724_s20, %s717_s13 }
  0x24   : > { %p721_p2 = pneg %p720_p1  ;;  %p727_p11 = por %p726_p12, %p725_p4 }
  0x26   : > { %p728_p6 = pnand %p727_p11, %p721_p2 }
  0x28   : > { %731 = shalt.err (!%p728_p6)
}
  0x29   : > { %650 = dma.hbm_to_vmem [thread:$0]  (!%p878_p13), %s874_s25, 128, %s882_s27, %s88_s29  }
  0x2a   : > { %p1111_p9 = scmp.lt.s32.totalorder %s796_s9, 3  ;;  %p1112_p7 = scmp.ge.s32.totalorder %s796_s9, 1 }
  0x2c   : > { %p105_p0 = pnand %p1112_p7, %p1111_p9 }
  0x2d   : > { %s909_s21 = sand.u32 (!%p105_p0), 1, %s788_s7   ;;  %p1113_p6 = scmp.ne.s32.totalorder (!%p105_p0), %s1107_s17, 0 }
  0x2e   : > { %108 = sbr.rel (%p105_p0) target bundleno = 212 (0xd4), region = 24  ;;  %s619_s22 = sshll.u32 (!%p105_p0), %s909_s21, 3 }
  0x2f   : > { %s111_s23 = scalar_lea.sflag (!%p105_p0), [#allocation3], %s909_s21  ;;  %s114_s24 = scalar_lea.vmem (!%p105_p0), [#allocation2], %s619_s22 }
  0x33   : > { %775 = dma.done.wait (%p1113_p6), %s111_s23, 128  }
  0x34   : > { %777 = vsyncadd (%p1113_p6), %s111_s23, 4294967168  ;;  %v150_v0 = vlaneseq  ;;  %v135_v1 = vld [vmem:[%s114_s24] sm:$0xff]  ;;  %v799_v36 = vmov 0.0   ;;  %s642_s17 = sshll.u32 %s832_s10, 7  ;;  %s132_s25 = scalar_lea.vmem [#allocation5], %s619_s22 }
  0x35   : > { %v621_v2 = vrot.slane %v135_v1, 9  ;;  %v622_v3 = vrot.slane %v135_v1, 10  ;;  %v623_v6 = vrot.slane %v135_v1, 11  ;;  %s542_s26 = sshll.u32 %s132_s25, 4  ;;  %s540_s29 = scalar_lea.hbm %s1103_s1, %s642_s17  ;;  %s543_s26 = int_to_ptr.vmem [resolvable:$true] %s542_s26 }
  0x36   : > { %v919_v4 = vshrl.u32 %v150_v0, 7  ;;  %s528_s30 = scalar_lea.sflag [#allocation4], %s909_s21  ;;  %s732_s2 = scalar_lea.vmem %s543_s26, 128 }
  0x37   : > { %v140_v5 = vmax.f32 %v135_v1, %v621_v2  ;;  %p733_p11 = scmp.ne.s32.totalorder %s543_s26, %s732_s2  ;;  %p1114_p12 = scmp.ne.s32.totalorder %s1108_s18, 0 }
  0x38   : > { %v922_v8 = vsub.s32 0, %v919_v4  ;;  %v156_v9 = vsub.s32 4, %v919_v4  ;;  %v929_v17 = vsub.s32 1, %v919_v4  ;;  %v237_v18 = vsub.s32 5, %v919_v4  ;;  %s800_s3 = smov [#allocation5]  }
  0x39   : > { %v144_v7 = vmax.f32 %v140_v5, %v622_v3  ;;  %v945_v25 = vsub.s32 2, %v919_v4  ;;  %v289_v26 = vsub.s32 6, %v919_v4  ;;  %v958_v33 = vsub.s32 3, %v919_v4  ;;  %p734_p13 = pnand %p733_p11, %p1114_p12  ;;  %s736_s4 = sshll.u32 %s800_s3, 4  ;;  %s737_s4 = int_to_ptr.vmem [resolvable:$false] %s736_s4 }
  0x3a   : > { %v341_v35 = vsub.s32 7, %v919_v4  ;;  %s738_s10 = scalar_lea.vmem %s737_s4, 256  ;;  %p739_p3 = scmp.lt.s32.totalorder %s543_s26, %s737_s4 }
  0x3b   : > { %v148_v10 = vmax.f32 %v144_v7, %v623_v6  ;;  %p735_p1 = pneg %p734_p13  ;;  %p740_p5 = scmp.lt.s32.totalorder %s738_s10, %s732_s2 }
  0x3d   : > { %v153_v11 = vrot.slane %v148_v10, %v922_v8  ;;  %v157_v12 = vrot.slane %v148_v10, %v156_v9  ;;  %p741_p8 = por %p740_p5, %p739_p3 }
  0x3f   : > { %v163_v13 = vrot.slane %v153_v11, %v922_v8  ;;  %v167_v14 = vrot.slane %v157_v12, %v922_v8  ;;  %p742_p10 = pnand %p741_p8, %p735_p1 }
  0x41   : > { %v170_v15 = vcombine.low %v163_v13, %v167_v14 }
  0x43   : > { %v172_v16 = vsub.f32 %v135_v1, %v170_v15 }
  0x45   : > { %v932_v19 = vmul.f32 0.5, %v172_v16 }
  0x47   : > { %v178_v20 = vrot.slane %v932_v19, %v922_v8  ;;  %v182_v21 = vrot.slane %v932_v19, %v156_v9  ;;  %v939_v22 = vcombine.high %v932_v19, %v932_v19  ;;  %v234_v23 = vrot.slane %v932_v19, %v929_v17 }
  0x48   : > { %v238_v24 = vrot.slane %v932_v19, %v237_v18  ;;  %v286_v31 = vrot.slane %v932_v19, %v945_v25  ;;  %v290_v32 = vrot.slane %v932_v19, %v289_v26  ;;  %v207_v34 = vmul.f32 %v932_v19, %v932_v19 }
  0x49   : > { %v188_v27 = vrot.slane %v178_v20, %v922_v8  ;;  %v192_v28 = vrot.slane %v182_v21, %v922_v8  ;;  %v244_v29 = vrot.slane %v234_v23, %v929_v17  ;;  %v338_v47 = vrot.slane %v932_v19, %v958_v33 }
  0x4a   : > { %v248_v30 = vrot.slane %v238_v24, %v929_v17  ;;  %v296_v41 = vrot.slane %v286_v31, %v945_v25  ;;  %v300_v42 = vrot.slane %v290_v32, %v945_v25  ;;  %v212_v43 = vrot.slane %v207_v34, %v922_v8 }
  0x4b   : > { %vm195_vm0 = vcmp.ge.f32.partialorder %v188_v27, %v932_v19  ;;  %vm196_vm1 = vcmp.ge.f32.partialorder %v192_v28, %v939_v22  ;;  %vm249_vm2 = vcmp.ge.f32.partialorder %v244_v29, %v932_v19  ;;  %v216_v44 = vrot.slane %v207_v34, %v156_v9 }
  0x4c   : > { %vm250_vm3 = vcmp.ge.f32.partialorder %v248_v30, %v939_v22  ;;  %v624_v37 = vsel %vm195_vm0, 1.0, %v799_v36  ;;  %v625_v38 = vsel %vm196_vm1, 1.0, %v799_v36  ;;  %v626_v39 = vsel %vm249_vm2, 1.0, %v799_v36 }
  0x4d   : > { %v627_v40 = vsel %vm250_vm3, 1.0, %v799_v36  ;;  %v255_v45 = vadd.f32 %v626_v39, %v624_v37  ;;  %vm301_vm4 = vcmp.ge.f32.partialorder %v296_v41, %v932_v19  ;;  %vm302_vm5 = vcmp.ge.f32.partialorder %v300_v42, %v939_v22 }
  0x4e   : > { %v256_v46 = vadd.f32 %v627_v40, %v625_v38  ;;  %v342_v48 = vrot.slane %v932_v19, %v341_v35  ;;  %v264_v49 = vrot.slane %v207_v34, %v929_v17  ;;  %v628_v50 = vsel %vm301_vm4, 1.0, %v799_v36 }
  0x4f   : > { %v629_v51 = vsel %vm302_vm5, 1.0, %v799_v36  ;;  %v268_v52 = vrot.slane %v207_v34, %v237_v18  ;;  %v222_v53 = vrot.slane %v212_v43, %v922_v8  ;;  %v226_v54 = vrot.slane %v216_v44, %v922_v8 }
  0x50   : > { %v307_v55 = vadd.f32 %v628_v50, %v255_v45  ;;  %v308_v56 = vadd.f32 %v629_v51, %v256_v46  ;;  %v348_v57 = vrot.slane %v338_v47, %v958_v33  ;;  %v352_v58 = vrot.slane %v342_v48, %v958_v33 }
  0x51   : > { %v203_v59 = vsel %vm195_vm0, %v188_v27, 0.0  ;;  %v274_v60 = vrot.slane %v264_v49, %v929_v17  ;;  %v316_v61 = vrot.slane %v207_v34, %v945_v25  ;;  %v278_v62 = vrot.slane %v268_v52, %v929_v17 }
  0x52   : > { %v320_v63 = vrot.slane %v207_v34, %v289_v26  ;;  %vm353_vm6 = vcmp.ge.f32.partialorder %v348_v57, %v932_v19  ;;  %vm354_vm7 = vcmp.ge.f32.partialorder %v352_v58, %v939_v22  ;;  %v204_v0 = vsel %vm196_vm1, %v192_v28, 0.0 }
  0x53   : > { %v227_v1 = vsel %vm195_vm0, %v222_v53, 0.0  ;;  %v630_v2 = vsel %vm353_vm6, 1.0, %v799_v36  ;;  %v631_v3 = vsel %vm354_vm7, 1.0, %v799_v36  ;;  %v228_v4 = vsel %vm196_vm1, %v226_v54, 0.0 }
  0x54   : > { %v257_v5 = vsel %vm249_vm2, %v244_v29, 0.0  ;;  %v1017_v6 = vadd.f32 %v630_v2, %v307_v55  ;;  %v1019_v7 = vadd.f32 %v631_v3, %v308_v56  ;;  %v258_v9 = vsel %vm250_vm3, %v248_v30, 0.0 }
  0x55   : > { %v279_v10 = vsel %vm249_vm2, %v274_v60, 0.0  ;;  %v326_v11 = vrot.slane %v316_v61, %v945_v25  ;;  %v368_v12 = vrot.slane %v207_v34, %v958_v33  ;;  %v280_v13 = vsel %vm250_vm3, %v278_v62, 0.0 }
  0x56   : > { %v330_v14 = vrot.slane %v320_v63, %v945_v25  ;;  %v372_v15 = vrot.slane %v207_v34, %v341_v35  ;;  %690 = vrcp.f32 %v1017_v6  ;;  %v259_v16 = vadd.f32 %v257_v5, %v203_v59 }
  0x57   : > { %692 = vrcp.f32 %v1019_v7  ;;  %v260_v17 = vadd.f32 %v258_v9, %v204_v0  ;;  %v281_v18 = vadd.f32 %v279_v10, %v227_v1  ;;  %v282_v20 = vadd.f32 %v280_v13, %v228_v4 }
  0x58   : > { %v309_v21 = vsel %vm301_vm4, %v296_v41, 0.0  ;;  %v331_v23 = vsel %vm301_vm4, %v326_v11, 0.0  ;;  %v378_v24 = vrot.slane %v368_v12, %v958_v33  ;;  %v310_v25 = vsel %vm302_vm5, %v300_v42, 0.0 }
  0x59   : > { %v332_v26 = vsel %vm302_vm5, %v330_v14, 0.0  ;;  %v382_v27 = vrot.slane %v372_v15, %v958_v33  ;;  %v311_v28 = vadd.f32 %v309_v21, %v259_v16  ;;  %v333_v29 = vadd.f32 %v331_v23, %v281_v18 }
  0x5a   : > { %v312_v30 = vadd.f32 %v310_v25, %v260_v17  ;;  %v334_v31 = vadd.f32 %v332_v26, %v282_v20  ;;  %v361_v32 = vsel %vm353_vm6, %v348_v57, 0.0  ;;  %v383_v34 = vsel %vm353_vm6, %v378_v24, 0.0 }
  0x5b   : > { %v362_v35 = vsel %vm354_vm7, %v352_v58, 0.0  ;;  %v384_v37 = vsel %vm354_vm7, %v382_v27, 0.0  ;;  %v363_v38 = vadd.f32 %v361_v32, %v311_v28  ;;  %v385_v39 = vadd.f32 %v383_v34, %v333_v29 }
  0x5c   : > { %v364_v40 = vadd.f32 %v362_v35, %v312_v30  ;;  %v386_v33 = vadd.f32 %v384_v37, %v334_v31 }
  0x63   : > { %v691_v41 = vpop.eup %690 }
  0x64   : > { %v693_v42 = vpop.eup %692  ;;  %v391_v43 = vmul.f32 %v691_v41, %v363_v38  ;;  %v393_v44 = vmul.f32 %v691_v41, %v385_v39 }
  0x65   : > { %v392_v45 = vmul.f32 %v693_v42, %v364_v40  ;;  %v394_v46 = vmul.f32 %v693_v42, %v386_v33 }
  0x66   : > { %v395_v47 = vmul.f32 %v391_v43, %v391_v43 }
  0x67   : > { %v396_v48 = vmul.f32 %v392_v45, %v392_v45 }
  0x68   : > { %v397_v49 = vsub.f32 %v393_v44, %v395_v47 }
  0x69   : > { %v398_v50 = vsub.f32 %v394_v46, %v396_v48 }
  0x6a   : > { %v399_v51 = vmul.f32 %v397_v49, %v1017_v6 }
  0x6b   : > { %v400_v52 = vmul.f32 %v398_v50, %v1019_v7 }
  0x6c   : > { %v401_v53 = vsub.f32 1.0, %v399_v51 }
  0x6d   : > { %v402_v54 = vsub.f32 1.0, %v400_v52 }
  0x6e   : > { %v403_v55 = vmul.f32 %v691_v41, %v401_v53 }
  0x6f   : > { %v404_v56 = vmul.f32 %v693_v42, %v402_v54 }
  0x70   : > { %v405_v57 = vmax.f32 %v403_v55, 0.0 }
  0x71   : > { %v406_v58 = vmax.f32 %v404_v56, 0.0 }
  0x72   : > { %694 = vrsqrt.f32 %v405_v57  ;;  %vm409_vm8 = vcmp.eq.f32.partialorder %v405_v57, inf  ;;  %v412_v60 = vand.u32 2147483648, %v405_v57  ;;  %vm411_vm9 = vcmp.eq.f32.partialorder %v405_v57, 0.0 }
  0x73   : > { %696 = vrsqrt.f32 %v406_v58  ;;  %vm416_vm10 = vcmp.eq.f32.partialorder %v406_v58, inf  ;;  %v419_v63 = vand.u32 2147483648, %v406_v58  ;;  %vm418_vm11 = vcmp.eq.f32.partialorder %v406_v58, 0.0 }
  0x7f   : > { %v695_v59 = vpop.eup %694 }
  0x80   : > { %v697_v61 = vpop.eup %696  ;;  %v408_v62 = vmul.f32 %v695_v59, %v405_v57 }
  0x81   : > { %v415_v0 = vmul.f32 %v697_v61, %v406_v58 }
  0x82   : > { %v410_v1 = vsel %vm409_vm8, %v405_v57, %v408_v62 }
  0x83   : > { %v413_v2 = vsel %vm411_vm9, %v412_v60, %v410_v1  ;;  %v417_v3 = vsel %vm416_vm10, %v406_v58, %v415_v0 }
  0x84   : > { %v420_v4 = vsel %vm418_vm11, %v419_v63, %v417_v3  ;;  %v421_v5 = vsub.f32 %v391_v43, %v413_v2 }
  0x85   : > { %v422_v9 = vsub.f32 %v392_v45, %v420_v4 }
  0x86   : > { %vm423_vm12 = vcmp.le.f32.partialorder %v421_v5, %v932_v19 }
  0x87   : > { %vm424_vm13 = vcmp.le.f32.partialorder %v422_v9, %v939_v22  ;;  %v632_v10 = vsel %vm423_vm12, 1.0, %v799_v36 }
  0x88   : > { %v633_v11 = vsel %vm424_vm13, 1.0, %v799_v36  ;;  %v431_v12 = vrot.slane %v632_v10, 1  ;;  %v437_v13 = vrot.slane %v632_v10, 2  ;;  %v443_v17 = vrot.slane %v632_v10, 3 }
  0x89   : > { %v432_v14 = vrot.slane %v633_v11, 1  ;;  %v438_v15 = vrot.slane %v633_v11, 2  ;;  %v444_v20 = vrot.slane %v633_v11, 3 }
  0x8a   : > { %v435_v16 = vadd.f32 %v632_v10, %v431_v12 }
  0x8b   : > { %v436_v18 = vadd.f32 %v633_v11, %v432_v14 }
  0x8c   : > { %v441_v21 = vadd.f32 %v437_v13, %v435_v16 }
  0x8d   : > { %v442_v23 = vadd.f32 %v438_v15, %v436_v18 }
  0x8e   : > { %v447_v24 = vadd.f32 %v443_v17, %v441_v21 }
  0x8f   : > { %v448_v25 = vadd.f32 %v444_v20, %v442_v23 }
  0x90   : > { %v452_v26 = vrot.slane %v447_v24, %v922_v8 }
  0x91   : > { %v456_v22 = vrot.slane %v448_v25, %v922_v8 }
  0x92   : > { %vm457_vm14 = vcmp.eq.f32.partialorder %v1017_v6, %v452_v26 }
  0x93   : > { %vm458_vm15 = vcmp.eq.f32.partialorder %v1019_v7, %v456_v22  ;;  %v634_v27 = vsel %vm457_vm14, 1.0, %v799_v36  ;;  %v483_v39 = vsel %vm457_vm14, %v421_v5, 0.0 }
  0x94   : > { %v635_v28 = vsel %vm458_vm15, 1.0, %v799_v36  ;;  %v465_v29 = vrot.slane %v634_v27, 1  ;;  %v471_v30 = vrot.slane %v634_v27, 2  ;;  %v477_v35 = vrot.slane %v634_v27, 3 }
  0x95   : > { %v466_v31 = vrot.slane %v635_v28, 1  ;;  %v472_v32 = vrot.slane %v635_v28, 2  ;;  %v478_v38 = vrot.slane %v635_v28, 3  ;;  %v484_v33 = vsel %vm458_vm15, %v422_v9, 0.0 }
  0x96   : > { %v469_v34 = vadd.f32 %v634_v27, %v465_v29  ;;  %v487_v6 = vrot.slane %v483_v39, 1  ;;  %v488_v7 = vrot.slane %v484_v33, 1  ;;  %v493_v36 = vrot.slane %v483_v39, 2 }
  0x97   : > { %v470_v37 = vadd.f32 %v635_v28, %v466_v31  ;;  %v494_v46 = vrot.slane %v484_v33, 2  ;;  %v499_v48 = vrot.slane %v483_v39, 3  ;;  %v500_v50 = vrot.slane %v484_v33, 3 }
  0x98   : > { %v475_v40 = vadd.f32 %v471_v30, %v469_v34  ;;  %v491_v44 = vadd.f32 %v487_v6, %v483_v39  ;;  %v492_v45 = vadd.f32 %v488_v7, %v484_v33 }
  0x99   : > { %v476_v41 = vadd.f32 %v472_v32, %v470_v37 }
  0x9a   : > { %v481_v42 = vadd.f32 %v477_v35, %v475_v40  ;;  %v497_v47 = vadd.f32 %v493_v36, %v491_v44  ;;  %v498_v49 = vadd.f32 %v494_v46, %v492_v45 }
  0x9b   : > { %v482_v43 = vadd.f32 %v478_v38, %v476_v41 }
  0x9c   : > { %698 = vrcp.f32 %v481_v42  ;;  %v503_v51 = vadd.f32 %v499_v48, %v497_v47  ;;  %v504_v52 = vadd.f32 %v500_v50, %v498_v49 }
  0x9d   : > { %700 = vrcp.f32 %v482_v43 }
  0xa9   : > { %v699_v53 = vpop.eup %698 }
  0xaa   : > { %v701_v54 = vpop.eup %700  ;;  %v506_v55 = vmul.f32 %v699_v53, %v503_v51 }
  0xab   : > { %v508_v56 = vmul.f32 %v701_v54, %v504_v52 }
  0xac   : > { %v512_v57 = vrot.slane %v506_v55, %v922_v8 }
  0xad   : > { %v516_v58 = vrot.slane %v508_v56, %v922_v8 }
  0xaf   : > { %v519_v59 = vcombine.low %v512_v57, %v516_v58 }
  0xb1   : > { %v521_v60 = vsub.f32 %v932_v19, %v519_v59 }
  0xb3   : > { %v522_v61 = vmax.f32 %v521_v60, 0.0 }
  0xb5   : > { %v523_v62 = vmul.f32 %v522_v61, %v522_v61 }
  0xb7   : > { %702 = vlog2.f32 %v523_v62 }
  0xc4   : > { %v703_v63 = vpop.eup %702 }
  0xc5   : > { %v525_v0 = vmul.f32 0.6931472, %v703_v63 }
  0xc7   : > { %526 = vst [vmem:[%s132_s25] sm:$0xff] %v525_v0 }
  0xc8   : > { %745 = shalt.err (!%p742_p10)
}
  0xc9   : > { %s746_s5 = scalar_lea.hbm %s540_s29, 128  ;;  %s750_s14 = scalar_lea.hbm %s1103_s1, 256 }
  0xca   : > { %p747_p2 = scmp.ne.s32.totalorder %s540_s29, %s746_s5  ;;  %p751_p7 = scmp.lt.s32.totalorder %s540_s29, %s1103_s1 }
  0xcb   : > { %p752_p0 = scmp.lt.s32.totalorder %s750_s14, %s746_s5 }
  0xcc   : > { %p748_p4 = pnand %p747_p2, %p1114_p12 }
  0xcd   : > { %p753_p6 = por %p752_p0, %p751_p7 }
  0xce   : > { %p749_p9 = pneg %p748_p4 }
  0xd0   : > { %p754_p11 = pnand %p753_p6, %p749_p9 }
  0xd2   : > { %757 = shalt.err (!%p754_p11)
}
  0xd3   : > { %645 = dma.vmem_to_hbm [thread:$0]  (%p1114_p12), %s543_s26, 128, %s540_s29, %s528_s30  }
  0xd4 PF: > { %s554_s21 = sand.u32 1, %s784_s6   ;;  %p1115_p13 = scmp.ne.s32.totalorder %s1109_s19, 0 }
  0xd5   : > { %p1116_p1 = scmp.ge.s32.totalorder %s796_s9, 2  ;;  %s555_s22 = scalar_lea.sflag [#allocation4], %s554_s21 }
  0xd7   : > { %p652_p3 = pnand %p1116_p1, %p1115_p13 }
  0xd9   : > { %p653_p5 = pneg %p652_p3 }
  0xdb   : > { %779 = dma.done.wait (%p653_p5), %s555_s22, 128  }
  0xdc   : > { %781 = vsyncadd (%p653_p5), %s555_s22, 4294967168  ;;  %p14_p8 = scmp.ge.s32.totalorder %s836_s12, 4   ;;  %s1117_s6 = smov %s788_s7 }
  0xdd   : > { %s1118_s7 = smov %s792_s8  ;;  %s1119_s8 = smov %s848_s15 }
  0xde   : > { %s1120_s9 = smov %s836_s12  ;;  %16 = sbr.rel (!%p14_p8) target bundleno = 5 (0x5), region = 69 }
  0xe3   :  { %560 = vsyncpa [#allocation3], 1 }
  0xe4   :  { %562 = vsyncpa [#allocation3 + $0x1], 1 }
  0xe5   :  { %563 = vsyncpa [#allocation4], 1 }
  0xe6   :  { %565 = vsyncpa [#allocation4 + $0x1], 1 }

</bundles_post_ra>
